<compile_context>
chip_gen: v5e
topology: v5e:2x2
jax: 0.10.0
libtpu: 0.0.40
codegen_flags: <defaults>
</compile_context>

<pallas_src>
import functools

import jax
import jax.numpy as jnp
from jax.experimental import pallas as pl
from jax.experimental.pallas import tpu as pltpu

EPS = 1e-7
BN_EPS = 1e-5


def _round_up(x, m):
    return (x + m - 1) // m * m


# ----------------------------- Pass 1: BN statistics ------------------------
def _bn_stats_kernel(u_ref, w1_ref, sums_ref, *, tn, n_rows, tiles_per_core):
    """Per-core partial [sum(h1); sum(h1*h1)] with h1 = u @ W1 (b1 cancels)."""
    c = pl.program_id(0)
    i = pl.program_id(1)

    @pl.when(i == 0)
    def _():
        sums_ref[...] = jnp.zeros_like(sums_ref)

    h1 = jnp.dot(u_ref[...], w1_ref[...], preferred_element_type=jnp.float32)

    # Mask rows past N: covers the partial tail tile and the clamped duplicate
    # tile the second core processes when the tile count is odd.
    tile = c * tiles_per_core + i
    row = tile * tn + jax.lax.broadcasted_iota(jnp.int32, h1.shape, 0)
    h1 = jnp.where(row < n_rows, h1, 0.0)

    sums_ref[0:1, 0:1, :] += jnp.sum(h1, axis=0, keepdims=True)[None]
    sums_ref[0:1, 1:2, :] += jnp.sum(h1 * h1, axis=0, keepdims=True)[None]


# ----------------------------- Pass 2: fused decoder ------------------------
def _decoder_kernel(u_ref, bidx_ref, w1_ref, s_ref, t_ref, wv_ref, w2_ref,
                    b2_ref, scale_ref, bias_ref, mu_ref, *, nbatches):
    u = u_ref[...]                                           # (TN, inc)

    # MLP branch: train-mode BN folded into one FMA (b1 cancels exactly under
    # train-mode BN, so it is dropped everywhere).
    h1 = jnp.dot(u, w1_ref[...], preferred_element_type=jnp.float32)
    h = jnp.maximum(h1 * s_ref[...] + t_ref[...], 0.0)       # BN affine + ReLU

    # Mixture: wd*(u@V^T) + wm*(h@W2^T + b2); mixture weights pre-folded into
    # the static weight stacks in the wrapper.  Two accumulating dots, no
    # [u|h] concat materialized in VMEM.
    out = (jnp.dot(u, wv_ref[...], preferred_element_type=jnp.float32)
           + jnp.dot(h, w2_ref[...], preferred_element_type=jnp.float32)
           + b2_ref[...])

    # Batch-conditional affine: VPU select-accumulate over the tiny
    # (nbatches, outc) tables (softplus already applied in the wrapper).
    # Exact one-hot semantics; keeps the MXU free for the real matmuls.
    bidx = bidx_ref[...]                                     # (TN, 1) int32
    scale = jnp.zeros_like(out)
    bias = jnp.zeros_like(out)
    for k in range(nbatches):                                # static, unrolled
        sel = (bidx == k).astype(jnp.float32)                # (TN, 1)
        scale = scale + sel * scale_ref[k:k + 1, :]
        bias = bias + sel * bias_ref[k:k + 1, :]

    mu_ref[...] = scale * out + bias                         # (TN, outc) lane-dense


# ----------------------------- wrapper ---------------------------------------
def distribution_mixture_decoder(u, v, batch_idx, params,
                                 weight_dot=0.5, weight_mlp=0.5,
                                 block_rows=1024):
    """Returns (mu, std) of the Normal produced by DistributionMixtureDecoder."""
    N, inc = u.shape
    outc = v.shape[0]
    H = params["w1"].shape[0]
    nbatches = params["scale_lin"].shape[0]

    # Static parameter prep (tiny one-off XLA ops).  Mixture weights folded
    # into the weight stacks; PyTorch (out,in) weights transposed to (in,out);
    # b1 dropped (cancels under train-mode BN); softplus hoisted off the
    # per-tile path.
    u = u.astype(jnp.float32)
    w1 = params["w1"].T.astype(jnp.float32)                              # (inc, H)
    wv = (weight_dot * v.T).astype(jnp.float32)                          # (inc, outc)
    w2m = (weight_mlp * params["w2"].T).astype(jnp.float32)              # (H, outc)
    b2m = (weight_mlp * params["b2"])[None, :].astype(jnp.float32)       # (1, outc)
    scale_tbl = jax.nn.softplus(params["scale_lin"]).astype(jnp.float32) # (nb, outc)
    bias_tbl = params["bias"].astype(jnp.float32)                        # (nb, outc)
    bidx = batch_idx.astype(jnp.int32)[:, None]                          # (N, 1)

    # Row tiling.  No pad copy: grid covers cdiv(N, tn) tiles; the tail tile
    # is masked in Pass 1 and its out-of-bounds writes are discarded in Pass 2.
    tn = _round_up(min(block_rows, N), 8)
    n_tiles = pl.cdiv(N, tn)

    # ---- Pass 1: exact full-batch BN statistics, split over 2 cores (v7x) ----
    tpc = pl.cdiv(n_tiles, 2)      # tiles per core; serial loop on 1-TC chips

    def _u_map(c, i):
        # clamp so the duplicated tile (odd tile count) stays in-bounds;
        # its contribution is masked to zero in-kernel.
        return (jnp.minimum(c * tpc + i, n_tiles - 1), 0)

    partials = pl.pallas_call(
        functools.partial(_bn_stats_kernel, tn=tn, n_rows=N,
                          tiles_per_core=tpc),
        out_shape=jax.ShapeDtypeStruct((2, 2, H), jnp.float32),
        grid=(2, tpc),
        in_specs=[pl.BlockSpec((tn, inc), _u_map),
                  pl.BlockSpec((inc, H), lambda c, i: (0, 0))],
        out_specs=pl.BlockSpec((1, 2, H), lambda c, i: (c, 0, 0)),
        compiler_params=pltpu.CompilerParams(
            dimension_semantics=("parallel", "arbitrary")),
    )(u, w1)
    sums = partials[0] + partials[1]                                     # (2, H)

    # Fold BN stats into a single per-feature affine (done once in XLA).
    inv_n = 1.0 / N
    mean = sums[0:1, :] * inv_n
    var = jnp.maximum(sums[1:2, :] * inv_n - mean * mean, 0.0)   # biased var (PyTorch BN)
    s = params["gamma"][None, :] * jax.lax.rsqrt(var + BN_EPS)
    t = params["beta"][None, :] - s * mean

    # ---- Pass 2: fused decoder on a row-parallel grid (megacore on v7x) ----
    flops = 2 * N * (inc * H + inc * outc + H * outc)
    bytes_accessed = 4 * (u.size + N + w1.size + wv.size + w2m.size
                          + 2 * H + outc + 2 * nbatches * outc + N * outc)
    cost = pl.CostEstimate(flops=int(flops), transcendentals=0,
                           bytes_accessed=int(bytes_accessed))

    mu = pl.pallas_call(
        functools.partial(_decoder_kernel, nbatches=nbatches),
        out_shape=jax.ShapeDtypeStruct((N, outc), jnp.float32),
        grid=(n_tiles,),
        in_specs=[
            pl.BlockSpec((tn, inc), lambda i: (i, 0)),             # u tile
            pl.BlockSpec((tn, 1), lambda i: (i, 0)),               # batch idx tile
            pl.BlockSpec((inc, H), lambda i: (0, 0)),              # W1 (resident)
            pl.BlockSpec((1, H), lambda i: (0, 0)),                # BN scale s
            pl.BlockSpec((1, H), lambda i: (0, 0)),                # BN shift t
            pl.BlockSpec((inc, outc), lambda i: (0, 0)),           # w_dot * V^T
            pl.BlockSpec((H, outc), lambda i: (0, 0)),             # w_mlp * W2^T
            pl.BlockSpec((1, outc), lambda i: (0, 0)),             # w_mlp * b2
            pl.BlockSpec((nbatches, outc), lambda i: (0, 0)),      # softplus(scale_lin)
            pl.BlockSpec((nbatches, outc), lambda i: (0, 0)),      # bias table
        ],
        out_specs=pl.BlockSpec((tn, outc), lambda i: (i, 0)),
        compiler_params=pltpu.CompilerParams(
            dimension_semantics=("parallel",)),
        cost_estimate=cost,
    )(u, bidx, w1, s, t, wv, w2m, b2m, scale_tbl, bias_tbl)

    # std is independent of u: exact softplus(std_lin)[batch_idx] + EPS,
    # computed as a tiny XLA gather outside the kernel.
    std = jax.nn.softplus(params["std_lin"])[batch_idx] + EPS
    return mu, std


# ----------------------------- pure-jnp reference ----------------------------
def _reference(u, v, batch_idx, params, weight_dot=0.5, weight_mlp=0.5):
    h = u @ params["w1"].T + params["b1"]
    mean = jnp.mean(h, axis=0, keepdims=True)
    var = jnp.mean((h - mean) ** 2, axis=0, keepdims=True)
    h = (h - mean) / jnp.sqrt(var + BN_EPS) * params["gamma"] + params["beta"]
    h = jnp.maximum(h, 0.0)
    out_mlp = h @ params["w2"].T + params["b2"]
    out_dot = u @ v.T
    out = weight_dot * out_dot + weight_mlp * out_mlp
    scale = jax.nn.softplus(params["scale_lin"][batch_idx])
    mu = scale * out + params["bias"][batch_idx]
    std = jax.nn.softplus(params["std_lin"][batch_idx]) + EPS
    return mu, std


if __name__ == "__main__":
    # Small shapes consistent with the module's forward:
    #   u: (N, inc), v: (outc, inc), batch index: (N,)
    # Feature dims chosen lane-dense (multiples of 128).
    N, inc, H, outc, nbatches = 20, 128, 128, 128, 4

    key = jax.random.PRNGKey(0)
    ks = jax.random.split(key, 12)

    u = jax.random.normal(ks[0], (N, inc), dtype=jnp.float32)
    v = jax.random.normal(ks[1], (outc, inc), dtype=jnp.float32) * 0.1
    batch_idx = jax.random.randint(ks[2], (N,), 0, nbatches)

    params = {
        # VanillaMLP: Linear(inc, H) -> BN(H) -> ReLU -> Linear(H, outc)
        "w1": jax.random.normal(ks[3], (H, inc), dtype=jnp.float32) * 0.1,
        "b1": jax.random.normal(ks[4], (H,), dtype=jnp.float32) * 0.1,
        "gamma": 1.0 + 0.1 * jax.random.normal(ks[5], (H,), dtype=jnp.float32),
        "beta": 0.1 * jax.random.normal(ks[6], (H,), dtype=jnp.float32),
        "w2": jax.random.normal(ks[7], (outc, H), dtype=jnp.float32) * 0.1,
        "b2": jax.random.normal(ks[8], (outc,), dtype=jnp.float32) * 0.1,
        # DistributionTransformer 'batch'-style params (zeros in the module's
        # __init__; perturbed here so the per-batch path is exercised).
        "scale_lin": 0.5 * jax.random.normal(ks[9], (nbatches, outc), dtype=jnp.float32),
        "bias": 0.5 * jax.random.normal(ks[10], (nbatches, outc), dtype=jnp.float32),
        "std_lin": 0.5 * jax.random.normal(ks[11], (nbatches, outc), dtype=jnp.float32),
    }

    # block_rows=8 -> several row tiles at this toy N, so the two-core tiled
    # BN reduction, the partial tail tile and the parallel row grid are all
    # exercised without any wrapper-side padding copy.
    mu, std = distribution_mixture_decoder(u, v, batch_idx, params, block_rows=8)
    jax.block_until_ready((mu, std))

    mu_ref, std_ref = _reference(u, v, batch_idx, params)
    assert mu.shape == mu_ref.shape and std.shape == std_ref.shape
    assert jnp.allclose(mu, mu_ref, atol=2e-4, rtol=2e-4), "mu mismatch"
    assert jnp.allclose(std, std_ref, atol=1e-5, rtol=1e-5), "std mismatch"

    print("KERNEL_OK")
</pallas_src>

<mosaic_0001>
module attributes {stable_mosaic.version = 11 : i64} {
  func.func @_bn_stats_kernel(%arg0: i32, %arg1: i32, %arg2: memref<8x128xf32, #tpu.memory_space<vmem>>, %arg3: memref<128x128xf32, #tpu.memory_space<vmem>>, %arg4: memref<1x2x128xf32, #tpu.memory_space<vmem>>) attributes {dimension_semantics = [#tpu.dimension_semantics<parallel>, #tpu.dimension_semantics<arbitrary>], iteration_bounds = array<i64: 2, 2>, scalar_prefetch = 0 : i64, scratch_operands = 0 : i64, tpu.core_type = #tpu.core_type<tc>, window_params = [{transform_indices = @transform_0, window_bounds = array<i64: 8, 128>}, {pipeline_mode = #tpu.pipeline_mode<synchronous>, transform_indices = @transform_1, window_bounds = array<i64: 128, 128>}, {transform_indices = @transform_2, window_bounds = array<i64: 1, 2, 128>}]} {
    %c0_i32 = arith.constant 0 : i32
    %0 = arith.cmpi eq, %arg1, %c0_i32 : i32
    %1 = arith.extui %0 : i1 to i32
    %c0_i32_0 = arith.constant 0 : i32
    %2 = arith.cmpi ne, %1, %c0_i32_0 : i32
    scf.if %2 {
      %cst_18 = arith.constant 0.000000e+00 : f32
      %29 = vector.broadcast %cst_18 : f32 to vector<1x2x128xf32>
      %c0_19 = arith.constant 0 : index
      %c0_20 = arith.constant 0 : index
      %c0_21 = arith.constant 0 : index
      %30 = vector.load %arg4[%c0_19, %c0_20, %c0_21] : memref<1x2x128xf32, #tpu.memory_space<vmem>>, vector<1x2x128xf32>
      tpu.vector_store %arg4[%c0_19, %c0_20, %c0_21], %29 {strides = array<i32>} : memref<1x2x128xf32, #tpu.memory_space<vmem>>, vector<1x2x128xf32>,
    } else {
    }
    %c0 = arith.constant 0 : index
    %c0_1 = arith.constant 0 : index
    %3 = vector.load %arg2[%c0, %c0_1] : memref<8x128xf32, #tpu.memory_space<vmem>>, vector<8x128xf32>
    %c0_2 = arith.constant 0 : index
    %c0_3 = arith.constant 0 : index
    %4 = vector.load %arg3[%c0_2, %c0_3] : memref<128x128xf32, #tpu.memory_space<vmem>>, vector<128x128xf32>
    %cst = arith.constant dense<0.000000e+00> : vector<8x128xf32>
    %5 = tpu.matmul %3, %4, %cst {dimension_numbers = #tpu.dot_dimension_numbers<[1], [0], [0], [1], [0, 0, 1, 1], [], []>} : vector<8x128xf32>, vector<128x128xf32>, vector<8x128xf32> -> vector<8x128xf32>
    %c2_i32 = arith.constant 2 : i32
    %6 = arith.muli %arg0, %c2_i32 : i32
    %7 = arith.addi %6, %arg1 : i32
    %c8_i32 = arith.constant 8 : i32
    %8 = arith.muli %7, %c8_i32 : i32
    %9 = tpu.iota {dimensions = array<i32: 0>} : vector<8x128xi32>
    %10 = vector.broadcast %8 : i32 to vector<8x128xi32>
    %11 = arith.addi %10, %9 : vector<8x128xi32>
    %c20_i32 = arith.constant 20 : i32
    %12 = vector.broadcast %c20_i32 : i32 to vector<8x128xi32>
    %13 = arith.cmpi slt, %11, %12 : vector<8x128xi32>
    %cst_4 = arith.constant 0.000000e+00 : f32
    %14 = vector.broadcast %cst_4 : f32 to vector<8x128xf32>
    %15 = arith.select %13, %5, %14 : vector<8x128xi1>, vector<8x128xf32>
    %c0_5 = arith.constant 0 : index
    %c0_6 = arith.constant 0 : index
    %c0_7 = arith.constant 0 : index
    %16 = vector.load %arg4[%c0_5, %c0_6, %c0_7] : memref<1x2x128xf32, #tpu.memory_space<vmem>>, vector<1x1x128xf32>
    %cst_8 = arith.constant dense<0.000000e+00> : vector<128xf32>
    %17 = vector.multi_reduction <add>, %15, %cst_8 [0] : vector<8x128xf32> to vector<128xf32>
    %18 = vector.shape_cast %17 : vector<128xf32> to vector<1x128xf32>
    %19 = vector.shape_cast %18 : vector<1x128xf32> to vector<1x1x128xf32>
    %20 = arith.addf %16, %19 : vector<1x1x128xf32>
    %c0_9 = arith.constant 0 : index
    %c0_10 = arith.constant 0 : index
    %c0_11 = arith.constant 0 : index
    %21 = vector.load %arg4[%c0_9, %c0_10, %c0_11] : memref<1x2x128xf32, #tpu.memory_space<vmem>>, vector<1x1x128xf32>
    tpu.vector_store %arg4[%c0_9, %c0_10, %c0_11], %20 {strides = array<i32>} : memref<1x2x128xf32, #tpu.memory_space<vmem>>, vector<1x1x128xf32>,
    %c0_12 = arith.constant 0 : index
    %c1 = arith.constant 1 : index
    %c0_13 = arith.constant 0 : index
    %22 = vector.load %arg4[%c0_12, %c1, %c0_13] : memref<1x2x128xf32, #tpu.memory_space<vmem>>, vector<1x1x128xf32>
    %23 = arith.mulf %15, %15 : vector<8x128xf32>
    %cst_14 = arith.constant dense<0.000000e+00> : vector<128xf32>
    %24 = vector.multi_reduction <add>, %23, %cst_14 [0] : vector<8x128xf32> to vector<128xf32>
    %25 = vector.shape_cast %24 : vector<128xf32> to vector<1x128xf32>
    %26 = vector.shape_cast %25 : vector<1x128xf32> to vector<1x1x128xf32>
    %27 = arith.addf %22, %26 : vector<1x1x128xf32>
    %c0_15 = arith.constant 0 : index
    %c1_16 = arith.constant 1 : index
    %c0_17 = arith.constant 0 : index
    %28 = vector.load %arg4[%c0_15, %c1_16, %c0_17] : memref<1x2x128xf32, #tpu.memory_space<vmem>>, vector<1x1x128xf32>
    tpu.vector_store %arg4[%c0_15, %c1_16, %c0_17], %27 {strides = array<i32>} : memref<1x2x128xf32, #tpu.memory_space<vmem>>, vector<1x1x128xf32>,
    return
  }
  func.func @transform_0(%arg0: i32, %arg1: i32) -> (i32, i32) {
    %c2_i32 = arith.constant 2 : i32
    %0 = arith.muli %arg0, %c2_i32 : i32
    %1 = arith.addi %0, %arg1 : i32
    %c2_i32_0 = arith.constant 2 : i32
    %2 = arith.minsi %1, %c2_i32_0 : i32
    %c0_i32 = arith.constant 0 : i32
    %c0_i32_1 = arith.constant 0 : i32
    return %2, %c0_i32 : i32, i32
  }
  func.func @transform_1(%arg0: i32, %arg1: i32) -> (i32, i32) {
    %c0_i32 = arith.constant 0 : i32
    %c0_i32_0 = arith.constant 0 : i32
    %c0_i32_1 = arith.constant 0 : i32
    return %c0_i32, %c0_i32_0 : i32, i32
  }
  func.func @transform_2(%arg0: i32, %arg1: i32) -> (i32, i32, i32) {
    %c0_i32 = arith.constant 0 : i32
    %c0_i32_0 = arith.constant 0 : i32
    %c0_i32_1 = arith.constant 0 : i32
    return %arg0, %c0_i32, %c0_i32_0 : i32, i32, i32
  }
}

</mosaic_0001>

<bundles_post_ra>
// kernel: tpu_custom_call.1
= control target key start
LH: loop header
LB: loop body
LE: loop exit
PB: predicated region body
PF: predicated region fallthrough
CT: control target
= control target key end

     0   :  { %s938_s0 = inlined_call_operand.hbm [shape: f32[20,128], index: 0, kind: input, shape index: {}]   ;;  %s939_s1 = inlined_call_operand.hbm [shape: f32[128,128], index: 1, kind: input, shape index: {}]   ;;  %s940_s2 = inlined_call_operand.hbm [shape: f32[2,2,128], index: 2, kind: output, shape index: {}]  }
   0x1   :  { %946 = sst [smem:[#allocation16_spill]] %s939_s1 }
   0x2   :  { %7 = vsyncpa [#allocation3], 0 }
   0x3   :  { %9 = vsyncpa [#allocation3 + $0x1], 0 }
   0x4   :  { %10 = vsyncpa [#allocation6], 0 }
   0x5   :  { %11 = vsyncpa [#allocation4], 0 }
   0x6   :  { %13 = vsyncpa [#allocation4 + $0x1], 0  ;;  %s727_s9 = smov 0   ;;  %s729_s10 = smov 0  }
   0x7   :  { %s731_s11 = smov 0   ;;  %s733_s12 = smov 0  }
   0x8   :  { %s735_s13 = smov 0   ;;  %s737_s14 = smov 0  }
   0x9   :  { %s739_s15 = smov 0   ;;  %s741_s16 = smov 0  }
   0xa   :  { %s743_s17 = smov 0   ;;  %s745_s18 = smov 0  }
   0xb   :  { %s747_s19 = smov 0  }
   0xc LB: > { %947 = sst [smem:[#allocation11_spill]] %s698_s17  ;;  %s383_s20 = sadd.s32 4294967295, %s706_s19   ;;  %s706_s19 = sphi %s747_s19, %s19_s19   ;;  %s702_s18 = sphi %s745_s18, %s963_s18   ;;  %s698_s17 = sphi %s743_s17, %s962_s17   ;;  %s694_s16 = sphi %s741_s16, %s961_s16   ;;  %s690_s15 = sphi %s739_s15, %s960_s15   ;;  %s686_s14 = sphi %s737_s14, %s969_s14   ;;  %s682_s13 = sphi %s735_s13, %s968_s13   ;;  %s678_s12 = sphi %s733_s12, %s967_s12   ;;  %s674_s11 = sphi %s731_s11, %s966_s11   ;;  %s670_s10 = sphi %s729_s10, %s965_s10   ;;  %s666_s9 = sphi %s727_s9, %s964_s9  }
   0xd   : > { %948 = sst [smem:[#allocation12_spill]] %s702_s18  ;;  %s384_s21 = sadd.s32 4294967294, %s706_s19  }
   0xe   : > { %p784_p0 = scmp.eq.s32.totalorder %s383_s20, 0  ;;  %p103_p1 = scmp.ne.s32.totalorder %s674_s11, %s670_s10 }
   0xf   : > { %p104_p2 = scmp.eq.s32.totalorder %s383_s20, 3  ;;  %p109_p3 = scmp.ne.s32.totalorder %s670_s10, %s666_s9 }
  0x10   : > { %p110_p4 = scmp.eq.s32.totalorder %s384_s21, 3  ;;  %p387_p5 = scmp.ge.s32.totalorder %s706_s19, 1 }
  0x11   : > { %p793_p6 = por %p104_p2, %p103_p1  ;;  %p117_p7 = scmp.lt.s32.totalorder %s706_s19, 5 }
  0x12   : > { %p798_p8 = por %p110_p4, %p109_p3  ;;  %s954_s1 = sld [smem:[#allocation16_spill]] }
  0x13   : > { %p802_p9 = pnand %p387_p5, %p117_p7  ;;  %s708_s29 = smov [#allocation5]  }
  0x14   : > { %s951_s24 = scalar_select %p798_p8, 1, 0 }
  0x15   : > { %p412_p10 = pneg %p802_p9  ;;  %s130_s30 = sshll.u32 %s708_s29, 4  ;;  %s131_s30 = int_to_ptr.vmem [resolvable:$true] %s130_s30 }
  0x16   : > { %952 = sst [smem:[#allocation13_spill]] %s951_s24  ;;  %s709_s3 = smov 128  }
  0x17   : > { %p413_p11 = pnand %p412_p10, %p784_p0  ;;  %s710_s4 = smov 8  }
  0x18   : > { %s128_s28 = sshll.u32 %s954_s1, 4  ;;  %s28_s5 = sadd.s32 1, %s698_s17  ;;  %s129_s28 = int_to_ptr.hbm [resolvable:$true] %s128_s28 }
  0x19   : > { %415 = dma.hbm_to_vmem [thread:$0]  (!%p413_p11), %s129_s28, 2048, %s131_s30, [#allocation6], %s709_s3, %s709_s3, %s710_s4  }
  0x1a   : > { %s31_s6 = sadd.s32 1, %s702_s18  ;;  %p29_p12 = scmp.ge.s32.totalorder %s28_s5, 2 }
  0x1b   : > { %s385_s7 = sshll.u32 %s702_s18, 1  ;;  %s46_s20 = sadd.s32 1, %s686_s14 }
  0x1c   : > { %s36_s8 = sadd.s32 %s698_s17, %s385_s7  ;;  %s971_s5 = smov (%p29_p12, %s28_s5), 0 }
  0x1d   : > { %955 = sst [smem:[#allocation14_spill]] %s971_s5  ;;  %s973_s6 = smov (!%p29_p12, %s31_s6), %s702_s18 }
  0x1e   : > { %p37_p13 = scmp.lt.s32.totalorder %s36_s8, 2  ;;  %p33_p1 = scmp.ge.s32.totalorder %s973_s6, 2 }
  0x1f   : > { %p53_p2 = scmp.ne.s32.totalorder %s686_s14, %s682_s13  ;;  %p54_p3 = scmp.eq.s32.totalorder %s706_s19, 0 }
  0x20   : > { %s975_s8 = smov (!%p37_p13, %s36_s8), 2  ;;  %s977_s6 = smov (%p33_p1, %s973_s6), 0 }
  0x21   : > { %956 = sst [smem:[#allocation15_spill]] %s977_s6  ;;  %p59_p4 = scmp.ne.s32.totalorder %s682_s13, %s678_s12 }
  0x22   : > { %s386_s21 = sshll.u32 %s977_s6, 1  ;;  %s90_s26 = ssub.s32 %s702_s18, %s977_s6 }
  0x23   : > { %s40_s27 = sadd.s32 %s386_s21, %s971_s5  ;;  %p834_p5 = por %p784_p0, %p59_p4 }
  0x24   : > { %p41_p7 = scmp.lt.s32.totalorder %s40_s27, 2  ;;  %p91_p10 = scmp.eq.s32.totalorder %s90_s26, 0 }
  0x25   : > { %p838_p11 = por %p54_p3, %p53_p2  ;;  %s93_s30 = sadd.s32 1, %s674_s11 }
  0x26   : > { %s979_s27 = smov (!%p41_p7, %s40_s27), 2  ;;  %s144_s4 = sand.u32 1, %s686_s14  }
  0x27   : > { %s844_s3 = scalar_select %p91_p10, %s674_s11, %s93_s30  }
  0x28   : > { %s43_s12 = ssub.s32 %s975_s8, %s979_s27  ;;  %p425_p13 = scmp.lt.s32.totalorder %s706_s19, 4 }
  0x29   : > { %p44_p12 = scmp.eq.s32.totalorder %s43_s12, 0  ;;  %s390_s7 = sshll.u32 %s144_s4, 3 }
  0x2a   : > { %s392_s21 = sshll.u32 %s975_s8, 3  ;;  %s148_s17 = scalar_lea.vmem [#allocation2], %s390_s7 }
  0x2b   : > { %s849_s1 = scalar_select %p44_p12, %s686_s14, %s46_s20  }
  0x2c   : > { %s156_s26 = scalar_lea.hbm %s938_s0, %s392_s21  ;;  %s160_s24 = sshll.u32 %s148_s17, 4  ;;  %s161_s24 = int_to_ptr.vmem [resolvable:$true] %s160_s24 }
  0x2d   : > { %s158_s18 = sshll.u32 %s156_s26, 4  ;;  %p417_p1 = pnand %p425_p13, %p838_p11  ;;  %s159_s18 = int_to_ptr.hbm [resolvable:$true] %s158_s18 }
  0x2e   : > { %s145_s30 = scalar_lea.sflag [#allocation3], %s144_s4  ;;  %169 = sbr.rel (%p802_p9) target bundleno = 241 (0xf1), region = 28 }
  0x2f   : > { %419 = dma.hbm_to_vmem [thread:$0]  (!%p417_p1), %s159_s18, 128, %s161_s24, %s145_s30  }
  0x30   : > { %s171_s8 = sand.u32 (!%p802_p9), 1, %s682_s13  }
  0x31   : > { %s859_s20 = sshll.u32 (!%p802_p9), %s171_s8, 3  ;;  %s172_s5 = scalar_lea.sflag (!%p802_p9), [#allocation3], %s171_s8 }
  0x32   : > { %s175_s6 = scalar_lea.vmem (!%p802_p9), [#allocation2], %s859_s20 }
  0x33   : > { %653 = dma.done.wait (%p834_p5), %s172_s5, 128  }
  0x34   : > { %655 = vsyncadd (%p834_p5), %s172_s5, 4294967168 }
  0x35   : > { %657 = dma.done.wait (%p784_p0), [#allocation6], 2048  }
  0x36   : > { %659 = vsyncadd (%p784_p0), [#allocation6], 4294965248  ;;  %s199_s17 = sand.u32 1, %s670_s10   ;;  %p397_p9 = scmp.ne.s32.totalorder %s690_s15, 0 }
  0x37   : > { %s396_s18 = sshll.u32 %s199_s17, 1 }
  0x38   : > { %s873_s24 = scalar_lea.vmem [#allocation7], %s396_s18  ;;  %209 = sbr.rel (%p397_p9) target bundleno = 63 (0x3f), region = 40 }
  0x3d   : > { %v711_v0 = vmov 0.0  }
  0x3e   : > { %210 = vst [vmem:[%s873_s24] sm:$0x3] %v711_v0 }
  0x3f PF: > { %v227_v1 = vld [vmem:[#allocation5 + $0x78] sm:$0xff]  ;;  %v226_v2 = vld [vmem:[#allocation5 + $0x70] sm:$0xff]  ;;  %v225_v3 = vld [vmem:[#allocation5 + $0x68] sm:$0xff]  ;;  %s398_s22 = sshll.u32 %s694_s16, 1  ;;  %v251_v18 = vlaneseq  ;;  %s289_s12 = sshll.u32 %s873_s24, 4  ;;  %s290_s12 = int_to_ptr.vmem [resolvable:$true] %s289_s12 }
  0x40   : > { %228 = vmatpush.msra.mxu0 %v227_v1  ;;  %v224_v4 = vld [vmem:[#allocation5 + $0x60] sm:$0xff]  ;;  %v223_v5 = vld [vmem:[#allocation5 + $0x58] sm:$0xff]  ;;  %v222_v6 = vld [vmem:[#allocation5 + $0x50] sm:$0xff]  ;;  %s249_s25 = sadd.s32 %s690_s15, %s398_s22  ;;  %s287_s28 = scalar_lea.hbm %s940_s2, %s398_s22 }
  0x41   : > { %v221_v7 = vld [vmem:[#allocation5 + $0x48] sm:$0xff]  ;;  %v220_v8 = vld [vmem:[#allocation5 + $0x40] sm:$0xff]  ;;  %v219_v9 = vld [vmem:[#allocation5 + $0x38] sm:$0xff]  ;;  %s399_s27 = sshll.u32 %s249_s25, 3  ;;  %v252_v19 = vshrl.u32 %v251_v18, 7  ;;  %s291_s29 = sshll.u32 %s287_s28, 4  ;;  %s292_s29 = int_to_ptr.hbm [resolvable:$true] %s291_s29 }
  0x42   : > { %229 = vmatpush.msra.mxu0 %v226_v2  ;;  %v218_v10 = vld [vmem:[#allocation5 + $0x30] sm:$0xff]  ;;  %v217_v11 = vld [vmem:[#allocation5 + $0x28] sm:$0xff]  ;;  %v216_v12 = vld [vmem:[#allocation5 + $0x20] sm:$0xff]  ;;  %v253_v20 = vstv %s399_s27  ;;  %s277_s4 = scalar_lea.sflag [#allocation4], %s199_s17  ;;  %s594_s7 = sshra.s32 %s292_s29, 4  ;;  %s595_s7 = int_to_ptr.hbm [resolvable:$true] %s594_s7 }
  0x43   : > { %v215_v13 = vld [vmem:[#allocation5 + $0x18] sm:$0xff]  ;;  %v214_v14 = vld [vmem:[#allocation5 + $0x10] sm:$0xff]  ;;  %v213_v15 = vld [vmem:[#allocation5 + $0x8] sm:$0xff]  ;;  %v254_v21 = vadd.s32 %v253_v20, %v252_v19  ;;  %s596_s21 = scalar_lea.hbm %s595_s7, 2  ;;  %s600_s8 = scalar_lea.hbm %s940_s2, 4 }
  0x44   : > { %230 = vmatpush.msra.mxu0 %v225_v3  ;;  %v212_v16 = vld [vmem:[#allocation5] sm:$0xff]  ;;  %v211_v17 = vld [vmem:[%s175_s6] sm:$0xff]  ;;  %p597_p0 = scmp.ne.s32.totalorder %s595_s7, %s596_s21  ;;  %p601_p4 = scmp.lt.s32.totalorder %s595_s7, %s940_s2 }
  0x45   : > { %vm255_vm0 = vcmp.lt.s32.totalorder %v254_v21, 20  ;;  %v257_v34 = vld [vmem:[%s873_s24] sm:$0x1]  ;;  %v266_v37 = vld [vmem:[%s873_s24 + $0x1] sm:$0x1]  ;;  %p602_p5 = scmp.lt.s32.totalorder %s600_s8, %s596_s21 }
  0x46   : > { %231 = vmatpush.msra.mxu0 %v224_v4  ;;  %p598_p2 = pnand %p597_p0, %p793_p6 }
  0x47   : > { %p603_p7 = por %p602_p5, %p601_p4 }
  0x48   : > { %232 = vmatpush.msra.mxu0 %v223_v5  ;;  %p599_p3 = pneg %p598_p2 }
  0x4a   : > { %233 = vmatpush.msra.mxu0 %v222_v6  ;;  %p604_p10 = pnand %p603_p7, %p599_p3 }
  0x4c   : > { %234 = vmatpush.msra.mxu0 %v221_v7 }
  0x4e   : > { %235 = vmatpush.msra.mxu0 %v220_v8 }
  0x50   : > { %236 = vmatpush.msra.mxu0 %v219_v9 }
  0x52   : > { %237 = vmatpush.msra.mxu0 %v218_v10 }
  0x54   : > { %238 = vmatpush.msra.mxu0 %v217_v11 }
  0x56   : > { %239 = vmatpush.msra.mxu0 %v216_v12 }
  0x58   : > { %240 = vmatpush.msra.mxu0 %v215_v13 }
  0x5a   : > { %241 = vmatpush.msra.mxu0 %v214_v14 }
  0x5c   : > { %242 = vmatpush.msra.mxu0 %v213_v15 }
  0x5e   : > { %243 = vmatpush.msra.mxu0 %v212_v16 }
  0x5f   : > { %244 = vmatmul.f32.vlgmr.msra.gmra.mxu0 %v211_v17 }
  0xdc   : > { %v245_v22 = vpop.f32.mrf.mxu0 }
  0xdd   : > { %v256_v23 = vsel %vm255_vm0, %v245_v22, 0.0 }
  0xde   : > { %v258_v24 = vrot.slane %v256_v23, 4  ;;  %v267_v25 = vmul.f32 %v256_v23, %v256_v23 }
  0xe0   : > { %v259_v26 = vadd.f32 %v258_v24, %v256_v23  ;;  %v268_v27 = vrot.slane %v267_v25, 4 }
  0xe2   : > { %v260_v28 = vrot.slane %v259_v26, 2  ;;  %v269_v29 = vadd.f32 %v268_v27, %v267_v25 }
  0xe4   : > { %v261_v30 = vadd.f32 %v260_v28, %v259_v26  ;;  %v270_v31 = vrot.slane %v269_v29, 2 }
  0xe6   : > { %v262_v32 = vrot.slane %v261_v30, 1  ;;  %v271_v33 = vadd.f32 %v270_v31, %v269_v29 }
  0xe8   : > { %v263_v35 = vadd.f32 %v262_v32, %v261_v30  ;;  %v272_v36 = vrot.slane %v271_v33, 1 }
  0xea   : > { %v273_v38 = vadd.f32 %v272_v36, %v271_v33  ;;  %v264_v39 = vadd.f32 %v263_v35, %v257_v34 }
  0xec   : > { %265 = vst [vmem:[%s873_s24] sm:$0x1] %v264_v39  ;;  %v274_v40 = vadd.f32 %v273_v38, %v266_v37 }
  0xee   : > { %275 = vst [vmem:[%s873_s24 + $0x1] sm:$0x1] %v274_v40 }
  0xef   : > { %607 = shalt.err (!%p604_p10)
}
  0xf0   : > { %410 = dma.vmem_to_hbm [thread:$0]  (%p793_p6), %s290_s12, 32, %s292_s29, %s277_s4  }
  0xf1 PF: > { %p427_p11 = scmp.ge.s32.totalorder %s706_s19, 2  ;;  %s303_s17 = sand.u32 1, %s666_s9  }
  0xf2   : > { %s304_s18 = scalar_lea.sflag [#allocation4], %s303_s17 }
  0xf3   : > { %p421_p12 = pnand %p427_p11, %p798_p8 }
  0xf5   : > { %p422_p13 = pneg %p421_p12 }
  0xf7   : > { %661 = dma.done.wait (%p422_p13), %s304_s18, 32  }
  0xf8   : > { %663 = vsyncadd (%p422_p13), %s304_s18, 4294967264  ;;  %s19_s19 = sadd.s32 1, %s706_s19   ;;  %s960_s15 = sld [smem:[#allocation11_spill]] }
  0xf9   : > { %p16_p1 = scmp.ge.s32.totalorder %s19_s19, 6   ;;  %s961_s16 = sld [smem:[#allocation12_spill]] }
  0xfa   : > { %s962_s17 = sld [smem:[#allocation14_spill]]  ;;  %s964_s9 = smov %s670_s10 }
  0xfb   : > { %s963_s18 = sld [smem:[#allocation15_spill]]  ;;  %s965_s10 = smov %s674_s11 }
  0xfc   : > { %s966_s11 = smov %s844_s3  ;;  %s967_s12 = smov %s682_s13 }
  0xfd   : > { %s968_s13 = smov %s686_s14  ;;  %s969_s14 = smov %s849_s1 }
  0xfe   :  { %18 = sbr.rel (!%p16_p1) target bundleno = 12 (0xc), region = 81 }
 0x103   :  { %310 = vsyncpa [#allocation3], 1 }
 0x104   :  { %312 = vsyncpa [#allocation3 + $0x1], 1 }
 0x105   :  { %313 = vsyncpa [#allocation6], 1 }
 0x106   :  { %314 = vsyncpa [#allocation4], 1 }
 0x107   :  { %316 = vsyncpa [#allocation4 + $0x1], 1 }

</bundles_post_ra>
